<compile_context>
chip_gen: v5e
topology: v5e:2x2
jax: 0.10.0
libtpu: 0.0.40
codegen_flags: <defaults>
</compile_context>

<pallas_src>
import jax
import jax.numpy as jnp
from jax.experimental import pallas as pl
from jax.experimental.pallas import tpu as pltpu


_LANE = 128
# 128K f32 spatial elements per tile -> x tile = 3 * 128K * 4B = 1.5 MiB,
# output tile the same; with double buffering ~6 MiB of VMEM, comfortably
# under the default scoped-VMEM limit on v5e / v6e / v7x.
_MAX_TILE_ELEMS = 128 * 1024


def _spatial_tile(hw):
    """Largest spatial tile that divides hw and is lane-aligned (multiple of
    128) or the full extent, while keeping the VMEM footprint modest."""
    if hw <= _MAX_TILE_ELEMS:
        return hw                        # single full-extent block (always legal)
    t = (_MAX_TILE_ELEMS // _LANE) * _LANE
    while t >= _LANE:
        if hw % t == 0:
            return t
        t -= _LANE
    return hw                            # no lane-aligned divisor; use full extent


def _conv1x1_kernel(x_ref, w_ref, b_ref, o_ref):
    """Per-image, per-spatial-tile 1x1 conv as VPU broadcast-FMAs.

    x_ref : (C_in,  TILE_S) f32 VMEM   -- spatial axis is the dense lane dim
    w_ref : (C_out, C_in)   f32 SMEM   -- read as scalars
    b_ref : (C_out,)        f32 SMEM
    o_ref : (C_out, TILE_S) f32 VMEM
    """
    c_in = x_ref.shape[0]
    c_out = o_ref.shape[0]
    x = x_ref[...]                                  # one VMEM load of the slab
    for co in range(c_out):                         # static unroll, c_out == 3
        acc = x[0:1, :] * w_ref[co, 0]
        for ci in range(1, c_in):                   # static unroll, c_in == 3
            acc = acc + x[ci:ci + 1, :] * w_ref[co, ci]
        o_ref[co:co + 1, :] = (acc + b_ref[co]).astype(o_ref.dtype)


@jax.jit
def conv1x1(x_nchw, weight, bias):
    """1x1 conv, stride 1, padding 0.

    x_nchw : (N, C_in, H, W) float32
    weight : (C_out, C_in, 1, 1) float32   (PyTorch Conv2d layout)
    bias   : (C_out,) float32
    returns (N, C_out, H, W) float32
    """
    N, C_in, H, W = x_nchw.shape
    C_out = weight.shape[0]
    HW = H * W

    # NCHW kept; pure reshapes only (no transposes, no padding).
    x3 = x_nchw.reshape(N, C_in, HW)
    w2 = weight.reshape(C_out, C_in)
    b1 = bias.reshape(C_out)

    tile_s = _spatial_tile(HW)
    grid = (N, HW // tile_s)

    cost = pl.CostEstimate(
        flops=2 * N * HW * C_in * C_out,
        transcendentals=0,
        bytes_accessed=4 * (N * HW * (C_in + C_out) + C_out * C_in + C_out),
    )

    out = pl.pallas_call(
        _conv1x1_kernel,
        out_shape=jax.ShapeDtypeStruct((N, C_out, HW), x_nchw.dtype),
        grid_spec=pltpu.PrefetchScalarGridSpec(
            num_scalar_prefetch=0,
            grid=grid,
            in_specs=[
                # batch dim squeezed; (C_in, tile_s) slab per step, lane-dense.
                pl.BlockSpec((None, C_in, tile_s), lambda n, s: (n, 0, s)),
                # tiny weight / bias tables live in SMEM, read as scalars.
                pl.BlockSpec(memory_space=pltpu.MemorySpace.SMEM),
                pl.BlockSpec(memory_space=pltpu.MemorySpace.SMEM),
            ],
            out_specs=pl.BlockSpec((None, C_out, tile_s), lambda n, s: (n, 0, s)),
        ),
        compiler_params=pltpu.CompilerParams(
            dimension_semantics=("parallel", "parallel"),
        ),
        cost_estimate=cost,
    )(x3, w2, b1)

    # (N, C_out, HW) is already NCHW up to a free reshape.
    return out.reshape(N, C_out, H, W)


if __name__ == "__main__":
    key = jax.random.PRNGKey(0)
    k_x, k_w, k_b = jax.random.split(key, 3)

    # Module: Conv2d(3, 3, kernel_size=1, stride=1, padding=0)
    N, C_in, C_out, H, W = 2, 3, 3, 16, 16

    x = jax.random.normal(k_x, (N, C_in, H, W), dtype=jnp.float32)
    # Deterministic parameter init (uniform in +-1/sqrt(fan_in), like PyTorch).
    bound = 1.0 / jnp.sqrt(jnp.float32(C_in * 1 * 1))
    weight = jax.random.uniform(k_w, (C_out, C_in, 1, 1), jnp.float32, -bound, bound)
    bias = jax.random.uniform(k_b, (C_out,), jnp.float32, -bound, bound)

    y = conv1x1(x, weight, bias)
    jax.block_until_ready(y)

    # Sanity check vs. plain-JAX reference (1x1 conv == channel matmul + bias).
    ref = jnp.einsum("nchw,oc->nohw", x, weight.reshape(C_out, C_in)) \
        + bias[None, :, None, None]
    assert y.shape == (N, C_out, H, W)
    assert jnp.allclose(y, ref, atol=1e-5, rtol=1e-5)

    print("KERNEL_OK")
</pallas_src>

<mosaic_0001>
module attributes {stable_mosaic.version = 11 : i64} {
  func.func @_conv1x1_kernel(%arg0: i32, %arg1: i32, %arg2: memref<1x3x256xf32, #tpu.memory_space<vmem>>, %arg3: memref<3x3xf32, #tpu.memory_space<smem>>, %arg4: memref<3xf32, #tpu.memory_space<smem>>, %arg5: memref<1x3x256xf32, #tpu.memory_space<vmem>>) attributes {dimension_semantics = [#tpu.dimension_semantics<parallel>, #tpu.dimension_semantics<parallel>], iteration_bounds = array<i64: 2, 1>, scalar_prefetch = 0 : i64, scratch_operands = 0 : i64, tpu.core_type = #tpu.core_type<tc>, window_params = [{transform_indices = @transform_0, window_bounds = array<i64: 1, 3, 256>}, {transform_indices = @transform_1, window_bounds = array<i64: 3, 3>}, {transform_indices = @transform_2, window_bounds = array<i64: 3>}, {transform_indices = @transform_3, window_bounds = array<i64: 1, 3, 256>}]} {
    %c0 = arith.constant 0 : index
    %c0_0 = arith.constant 0 : index
    %c0_1 = arith.constant 0 : index
    %0 = vector.load %arg2[%c0, %c0_0, %c0_1] : memref<1x3x256xf32, #tpu.memory_space<vmem>>, vector<1x3x256xf32>
    %1 = vector.shape_cast %0 : vector<1x3x256xf32> to vector<3x256xf32>
    %2 = vector.extract_strided_slice %1 {offsets = [0, 0], sizes = [1, 256], strides = [1, 1]} : vector<3x256xf32> to vector<1x256xf32>
    %c0_2 = arith.constant 0 : index
    %c0_3 = arith.constant 0 : index
    %3 = memref.load %arg3[%c0_2, %c0_3] : memref<3x3xf32, #tpu.memory_space<smem>>
    %4 = vector.broadcast %3 : f32 to vector<1x256xf32>
    %5 = arith.mulf %2, %4 : vector<1x256xf32>
    %6 = vector.extract_strided_slice %1 {offsets = [1, 0], sizes = [1, 256], strides = [1, 1]} : vector<3x256xf32> to vector<1x256xf32>
    %c0_4 = arith.constant 0 : index
    %c1 = arith.constant 1 : index
    %7 = memref.load %arg3[%c0_4, %c1] : memref<3x3xf32, #tpu.memory_space<smem>>
    %8 = vector.broadcast %7 : f32 to vector<1x256xf32>
    %9 = arith.mulf %6, %8 : vector<1x256xf32>
    %10 = arith.addf %5, %9 : vector<1x256xf32>
    %11 = vector.extract_strided_slice %1 {offsets = [2, 0], sizes = [1, 256], strides = [1, 1]} : vector<3x256xf32> to vector<1x256xf32>
    %c0_5 = arith.constant 0 : index
    %c2 = arith.constant 2 : index
    %12 = memref.load %arg3[%c0_5, %c2] : memref<3x3xf32, #tpu.memory_space<smem>>
    %13 = vector.broadcast %12 : f32 to vector<1x256xf32>
    %14 = arith.mulf %11, %13 : vector<1x256xf32>
    %15 = arith.addf %10, %14 : vector<1x256xf32>
    %c0_6 = arith.constant 0 : index
    %16 = memref.load %arg4[%c0_6] : memref<3xf32, #tpu.memory_space<smem>>
    %17 = vector.broadcast %16 : f32 to vector<1x256xf32>
    %18 = arith.addf %15, %17 : vector<1x256xf32>
    %c0_7 = arith.constant 0 : index
    %c0_8 = arith.constant 0 : index
    %c0_9 = arith.constant 0 : index
    %19 = vector.load %arg5[%c0_7, %c0_8, %c0_9] : memref<1x3x256xf32, #tpu.memory_space<vmem>>, vector<1x1x256xf32>
    %20 = vector.shape_cast %19 : vector<1x1x256xf32> to vector<1x256xf32>
    %21 = vector.shape_cast %18 : vector<1x256xf32> to vector<1x1x256xf32>
    tpu.vector_store %arg5[%c0_7, %c0_8, %c0_9], %21 {strides = array<i32>} : memref<1x3x256xf32, #tpu.memory_space<vmem>>, vector<1x1x256xf32>,
    %22 = vector.extract_strided_slice %1 {offsets = [0, 0], sizes = [1, 256], strides = [1, 1]} : vector<3x256xf32> to vector<1x256xf32>
    %c1_10 = arith.constant 1 : index
    %c0_11 = arith.constant 0 : index
    %23 = memref.load %arg3[%c1_10, %c0_11] : memref<3x3xf32, #tpu.memory_space<smem>>
    %24 = vector.broadcast %23 : f32 to vector<1x256xf32>
    %25 = arith.mulf %22, %24 : vector<1x256xf32>
    %26 = vector.extract_strided_slice %1 {offsets = [1, 0], sizes = [1, 256], strides = [1, 1]} : vector<3x256xf32> to vector<1x256xf32>
    %c1_12 = arith.constant 1 : index
    %c1_13 = arith.constant 1 : index
    %27 = memref.load %arg3[%c1_12, %c1_13] : memref<3x3xf32, #tpu.memory_space<smem>>
    %28 = vector.broadcast %27 : f32 to vector<1x256xf32>
    %29 = arith.mulf %26, %28 : vector<1x256xf32>
    %30 = arith.addf %25, %29 : vector<1x256xf32>
    %31 = vector.extract_strided_slice %1 {offsets = [2, 0], sizes = [1, 256], strides = [1, 1]} : vector<3x256xf32> to vector<1x256xf32>
    %c1_14 = arith.constant 1 : index
    %c2_15 = arith.constant 2 : index
    %32 = memref.load %arg3[%c1_14, %c2_15] : memref<3x3xf32, #tpu.memory_space<smem>>
    %33 = vector.broadcast %32 : f32 to vector<1x256xf32>
    %34 = arith.mulf %31, %33 : vector<1x256xf32>
    %35 = arith.addf %30, %34 : vector<1x256xf32>
    %c1_16 = arith.constant 1 : index
    %36 = memref.load %arg4[%c1_16] : memref<3xf32, #tpu.memory_space<smem>>
    %37 = vector.broadcast %36 : f32 to vector<1x256xf32>
    %38 = arith.addf %35, %37 : vector<1x256xf32>
    %c0_17 = arith.constant 0 : index
    %c1_18 = arith.constant 1 : index
    %c0_19 = arith.constant 0 : index
    %39 = vector.load %arg5[%c0_17, %c1_18, %c0_19] : memref<1x3x256xf32, #tpu.memory_space<vmem>>, vector<1x1x256xf32>
    %40 = vector.shape_cast %39 : vector<1x1x256xf32> to vector<1x256xf32>
    %41 = vector.shape_cast %38 : vector<1x256xf32> to vector<1x1x256xf32>
    tpu.vector_store %arg5[%c0_17, %c1_18, %c0_19], %41 {strides = array<i32>} : memref<1x3x256xf32, #tpu.memory_space<vmem>>, vector<1x1x256xf32>,
    %42 = vector.extract_strided_slice %1 {offsets = [0, 0], sizes = [1, 256], strides = [1, 1]} : vector<3x256xf32> to vector<1x256xf32>
    %c2_20 = arith.constant 2 : index
    %c0_21 = arith.constant 0 : index
    %43 = memref.load %arg3[%c2_20, %c0_21] : memref<3x3xf32, #tpu.memory_space<smem>>
    %44 = vector.broadcast %43 : f32 to vector<1x256xf32>
    %45 = arith.mulf %42, %44 : vector<1x256xf32>
    %46 = vector.extract_strided_slice %1 {offsets = [1, 0], sizes = [1, 256], strides = [1, 1]} : vector<3x256xf32> to vector<1x256xf32>
    %c2_22 = arith.constant 2 : index
    %c1_23 = arith.constant 1 : index
    %47 = memref.load %arg3[%c2_22, %c1_23] : memref<3x3xf32, #tpu.memory_space<smem>>
    %48 = vector.broadcast %47 : f32 to vector<1x256xf32>
    %49 = arith.mulf %46, %48 : vector<1x256xf32>
    %50 = arith.addf %45, %49 : vector<1x256xf32>
    %51 = vector.extract_strided_slice %1 {offsets = [2, 0], sizes = [1, 256], strides = [1, 1]} : vector<3x256xf32> to vector<1x256xf32>
    %c2_24 = arith.constant 2 : index
    %c2_25 = arith.constant 2 : index
    %52 = memref.load %arg3[%c2_24, %c2_25] : memref<3x3xf32, #tpu.memory_space<smem>>
    %53 = vector.broadcast %52 : f32 to vector<1x256xf32>
    %54 = arith.mulf %51, %53 : vector<1x256xf32>
    %55 = arith.addf %50, %54 : vector<1x256xf32>
    %c2_26 = arith.constant 2 : index
    %56 = memref.load %arg4[%c2_26] : memref<3xf32, #tpu.memory_space<smem>>
    %57 = vector.broadcast %56 : f32 to vector<1x256xf32>
    %58 = arith.addf %55, %57 : vector<1x256xf32>
    %c0_27 = arith.constant 0 : index
    %c2_28 = arith.constant 2 : index
    %c0_29 = arith.constant 0 : index
    %59 = vector.load %arg5[%c0_27, %c2_28, %c0_29] : memref<1x3x256xf32, #tpu.memory_space<vmem>>, vector<1x1x256xf32>
    %60 = vector.shape_cast %59 : vector<1x1x256xf32> to vector<1x256xf32>
    %61 = vector.shape_cast %58 : vector<1x256xf32> to vector<1x1x256xf32>
    tpu.vector_store %arg5[%c0_27, %c2_28, %c0_29], %61 {strides = array<i32>} : memref<1x3x256xf32, #tpu.memory_space<vmem>>, vector<1x1x256xf32>,
    return
  }
  func.func @transform_0(%arg0: i32, %arg1: i32) -> (i32, i32, i32) {
    %c0_i32 = arith.constant 0 : i32
    %c0_i32_0 = arith.constant 0 : i32
    return %arg0, %c0_i32, %arg1 : i32, i32, i32
  }
  func.func @transform_1(%arg0: i32, %arg1: i32) -> (i32, i32) {
    %c0_i32 = arith.constant 0 : i32
    %c0_i32_0 = arith.constant 0 : i32
    %c0_i32_1 = arith.constant 0 : i32
    return %c0_i32, %c0_i32_0 : i32, i32
  }
  func.func @transform_2(%arg0: i32, %arg1: i32) -> i32 {
    %c0_i32 = arith.constant 0 : i32
    %c0_i32_0 = arith.constant 0 : i32
    return %c0_i32 : i32
  }
  func.func @transform_3(%arg0: i32, %arg1: i32) -> (i32, i32, i32) {
    %c0_i32 = arith.constant 0 : i32
    %c0_i32_0 = arith.constant 0 : i32
    return %arg0, %c0_i32, %arg1 : i32, i32, i32
  }
}

</mosaic_0001>

<bundles_post_ra>
// kernel: conv1x1.1
= control target key start
LH: loop header
LB: loop body
LE: loop exit
PB: predicated region body
PF: predicated region fallthrough
CT: control target
= control target key end

     0   :  { %8 = vsyncpa [#allocation3], 0  ;;  %s680_s0 = inlined_call_operand.vmem [shape: f32[2,3,256], index: 0, kind: input, shape index: {}]   ;;  %s681_s1 = inlined_call_operand.vmem [shape: f32[3,3], index: 1, kind: input, shape index: {}]   ;;  %s682_s2 = inlined_call_operand.vmem [shape: f32[3], index: 2, kind: input, shape index: {}]   ;;  %s683_s3 = inlined_call_operand.vmem [shape: f32[2,3,256], index: 3, kind: output, shape index: {}]  }
   0x1   :  { %9 = vsyncpa [#allocation5], 0  ;;  %s599_s12 = smov 0   ;;  %s601_s13 = smov 0  }
   0x2   :  { %s603_s14 = smov 0  }
   0x3 LB: > { %s435_s15 = sadd.s32 4294967295, %s575_s14   ;;  %s27_s16 = sadd.s32 1, %s571_s13  ;;  %s575_s14 = sphi %s603_s14, %s15_s14   ;;  %s571_s13 = sphi %s601_s13, %s688_s13   ;;  %s567_s12 = sphi %s599_s12, %s687_s12  }
   0x4   : > { %p29_p0 = scmp.ge.s32.totalorder %s27_s16, 2  ;;  %p437_p1 = scmp.ge.s32.totalorder %s575_s14, 1 }
   0x5   : > { %p130_p2 = scmp.lt.s32.totalorder %s575_s14, 3  ;;  %p620_p4 = scmp.eq.s32.totalorder %s435_s15, 0 }
   0x6   : > { %s690_s16 = smov (%p29_p0, %s27_s16), 0  ;;  %s142_s20 = sshll.u32 %s681_s1, 4  ;;  %s143_s20 = int_to_ptr.vmem [resolvable:$true] %s142_s20 }
   0x7   : > { %p131_p3 = pnand %p437_p1, %p130_p2  ;;  %s152_s23 = sshll.u32 %s682_s2, 4  ;;  %s153_s23 = int_to_ptr.vmem [resolvable:$true] %s152_s23 }
   0x8   : > { %s577_s24 = smov [#allocation2]   ;;  %s578_s25 = smov [#allocation4]  }
   0x9   : > { %p478_p5 = pneg %p131_p3 }
   0xa   : > { %178 = sbr.rel (%p131_p3) target bundleno = 50 (0x32), region = 32 }
   0xb   : > { %p479_p6 = pnand %p620_p4, %p478_p5 }
   0xd   : > { %481 = dma.vmem_to_smem (!%p479_p6), %s143_s20, 64, %s577_s24, [#allocation3]  }
   0xe   : > { %484 = dma.vmem_to_smem (!%p479_p6), %s153_s23, 16, %s578_s25, [#allocation5]  }
   0xf   : > { %558 = dma.done.wait (%p620_p4), [#allocation3], 64  }
  0x10   : > { %560 = vsyncadd (%p620_p4), [#allocation3], 4294967232 }
  0x11   : > { %562 = dma.done.wait (%p620_p4), [#allocation5], 16  }
  0x12   : > { %564 = vsyncadd (%p620_p4), [#allocation5], 4294967280 }
  0x13   : > { %190 = sfence }
  0x14   : > { %p218_p7 = scmp.lt.s32.totalorder %s567_s12, 1  ;;  %s238_s26 = sld [smem:[#allocation2]]  ;;  %v265_v12 = vlaneseq  ;;  %vm262_vm0 = vcmask 1040384  }
  0x15   : > { %s448_s27 = sld [smem:[#allocation2 + $0x1]] }
  0x16   : > { %s692_s12 = smov (!%p218_p7, %s567_s12), 1  ;;  %s450_s28 = sld [smem:[#allocation2 + $0x2]]  ;;  %vm652_vm1 = vcmp.lt.s32.totalorder %v265_v12, 256 }
  0x17   : > { %s468_s29 = sshll.u32 %s692_s12, 3  ;;  %s257_s6 = sld [smem:[#allocation4]] }
  0x18   : > { %s225_s5 = scalar_lea.vmem %s680_s0, %s468_s29  ;;  %s452_s7 = sld [smem:[#allocation2 + $0x80]] }
  0x19   : > { %v237_v0 = vld [vmem:[%s225_s5] sm:$0x77]  ;;  %s453_s8 = sld [smem:[#allocation2 + $0x81]]  ;;  %s235_s21 = scalar_lea.vmem %s683_s3, %s468_s29 }
  0x1a   : > { %v239_v1 = vstv %s238_s26  ;;  %s455_s9 = sld [smem:[#allocation2 + $0x82]] }
  0x1b   : > { %v242_v2 = vstv %s448_s27  ;;  %v240_v3 = vmul.f32 %v239_v1, %v237_v0  ;;  %s650_s10 = sld [smem:[#allocation4 + $0x1]] }
  0x1c   : > { %v243_v4 = vmul.f32 %v242_v2, %v237_v0  ;;  %v250_v5 = vstv %s450_s28  ;;  %s459_s11 = sld [smem:[#allocation2 + $0x100]] }
  0x1d   : > { %v251_v7 = vmul.f32 %v250_v5, %v237_v0  ;;  %s460_s15 = sld [smem:[#allocation2 + $0x101]]  ;;  %v258_v11 = vstv %s257_s6 }
  0x1e   : > { %v449_v6 = vrot.slane %v243_v4, 9  ;;  %v271_v10 = vstv %s452_s7  ;;  %s462_s17 = sld [smem:[#allocation2 + $0x102]] }
  0x1f   : > { %v451_v9 = vrot.slane %v251_v7, 10  ;;  %v274_v13 = vstv %s453_s8  ;;  %v272_v15 = vmul.f32 %v271_v10, %v237_v0  ;;  %s464_s18 = sld [smem:[#allocation4 + $0x2]] }
  0x20   : > { %v248_v8 = vadd.f32 %v449_v6, %v240_v3  ;;  %v275_v16 = vmul.f32 %v274_v13, %v237_v0  ;;  %v282_v17 = vstv %s455_s9 }
  0x21   : > { %v283_v18 = vmul.f32 %v282_v17, %v237_v0  ;;  %v290_v30 = vstv %s650_s10 }
  0x22   : > { %v256_v14 = vadd.f32 %v451_v9, %v248_v8  ;;  %v454_v20 = vrot.slane %v275_v16, 9  ;;  %v299_v21 = vstv %s459_s11 }
  0x23   : > { %v456_v23 = vrot.slane %v283_v18, 10  ;;  %v300_v24 = vmul.f32 %v299_v21, %v237_v0  ;;  %v302_v25 = vstv %s460_s15 }
  0x24   : > { %v259_v19 = vadd.f32 %v258_v11, %v256_v14  ;;  %v280_v27 = vadd.f32 %v454_v20, %v272_v15  ;;  %v303_v28 = vmul.f32 %v302_v25, %v237_v0  ;;  %v310_v29 = vstv %s462_s17 }
  0x25   : > { %v311_v31 = vmul.f32 %v310_v29, %v237_v0  ;;  %v318_v38 = vstv %s464_s18 }
  0x26   : > { %v261_v26 = vrot.slane %v259_v19, 3  ;;  %v288_v33 = vadd.f32 %v456_v23, %v280_v27  ;;  %v461_v34 = vrot.slane %v303_v28, 9 }
  0x27   : > { %v463_v35 = vrot.slane %v311_v31, 10 }
  0x28   : > { %v263_v32 = vsel %vm262_vm0, %v259_v19, %v261_v26  ;;  %v291_v36 = vadd.f32 %v290_v30, %v288_v33  ;;  %v308_v37 = vadd.f32 %v461_v34, %v300_v24 }
  0x29   : > { %269 = vst.msk [vmem:[%s235_s21] ss:$4 sm:$0x3] %vm652_vm1, %v263_v32 }
  0x2a   : > { %v293_v39 = vrot.slane %v291_v36, 3  ;;  %v316_v40 = vadd.f32 %v463_v35, %v308_v37 }
  0x2c   : > { %v294_v41 = vsel %vm262_vm0, %v291_v36, %v293_v39  ;;  %v319_v42 = vadd.f32 %v318_v38, %v316_v40 }
  0x2d   : > { %458 = vst.msk [vmem:[%s235_s21 + $0x1] ss:$4 sm:$0x3] %vm652_vm1, %v294_v41 }
  0x2e   : > { %v321_v43 = vrot.slane %v319_v42, 3 }
  0x30   : > { %v322_v44 = vsel %vm262_vm0, %v319_v42, %v321_v43 }
  0x31   : > { %465 = vst.msk [vmem:[%s235_s21 + $0x2] ss:$4 sm:$0x3] %vm652_vm1, %v322_v44 }
  0x32 PF: > { %s15_s14 = sadd.s32 1, %s575_s14   ;;  %s687_s12 = smov %s571_s13 }
  0x33   : > { %p12_p8 = scmp.ge.s32.totalorder %s15_s14, 4   ;;  %s688_s13 = smov %s690_s16 }
  0x35   :  { %14 = sbr.rel (!%p12_p8) target bundleno = 3 (0x3), region = 73 }
  0x3a   :  { %356 = vsyncpa [#allocation3], 1 }
  0x3b   :  { %358 = vsyncpa [#allocation3 + $0x1], 1 }
  0x3c   :  { %359 = vsyncpa [#allocation5], 1 }

</bundles_post_ra>
